<compile_context>
chip_gen: v5e
topology: v5e:2x2
jax: 0.10.0
libtpu: 0.0.40
codegen_flags: <defaults>
</compile_context>

<pallas_src>
import functools

import jax
import jax.numpy as jnp
from jax.experimental import pallas as pl
from jax.experimental.pallas import tpu as pltpu


def _gem_kernel(p_ref, x_ref, o_ref, *, eps, hw):
    """GeM pooling for one batch tile.

    p_ref: (1,) f32 in SMEM        -- learnable exponent p.
    x_ref: (TN, HW, C) in VMEM     -- channels-last feature-map tile.
    o_ref: (TN, C)                 -- pooled output tile (lane-dense).
    """
    p = p_ref[0]                                        # scalar f32 from SMEM
    x = x_ref[...].astype(jnp.float32)                  # (TN, HW, C), f32 accumulate
    x = jnp.maximum(x, eps)                             # clamp(min=eps) -> strictly > 0
    xp = jnp.exp(jnp.log(x) * p)                        # x ** p (EUP exp/log; x > 0)
    pooled = jnp.sum(xp, axis=1) * (1.0 / hw)           # global avg pool over H*W -> (TN, C)
    out = jnp.exp(jnp.log(pooled) / p)                  # pooled ** (1/p)
    o_ref[...] = out.astype(o_ref.dtype)


def _pick_tile_n(n, hw, c, in_bytes, out_bytes, budget_bytes=12 * 1024 * 1024):
    """Largest batch tile whose double-buffered blocks fit a conservative VMEM budget."""
    per_row = 2 * hw * c * in_bytes + 2 * c * out_bytes   # 2x = double buffering
    tn = max(1, budget_bytes // per_row)
    if tn >= n:
        return n
    # Keep the blocked output's second-to-last dim sublane-aligned (multiple of 8).
    return max(8, (tn // 8) * 8)


def gem_pooling_nhwc(x_nhwc, p, *, eps=1e-6):
    """GeM pooling on an NHWC feature map. Returns (N, C)."""
    n, h, w, c = x_nhwc.shape
    hw = h * w
    x3 = x_nhwc.reshape(n, hw, c)                         # free reshape, C stays on lanes
    p_arr = jnp.asarray(p, dtype=jnp.float32).reshape(1)  # Parameter(torch.ones(1)*p)

    tn = _pick_tile_n(n, hw, c, x3.dtype.itemsize, x3.dtype.itemsize)
    grid = (pl.cdiv(n, tn),)

    return pl.pallas_call(
        functools.partial(_gem_kernel, eps=float(eps), hw=float(hw)),
        out_shape=jax.ShapeDtypeStruct((n, c), x3.dtype),
        grid=grid,
        in_specs=[
            pl.BlockSpec(memory_space=pltpu.MemorySpace.SMEM),      # p (scalar)
            pl.BlockSpec((tn, hw, c), lambda i: (i, 0, 0)),         # batch tile of x
        ],
        out_specs=pl.BlockSpec((tn, c), lambda i: (i, 0)),          # lane-dense (N, C)
        compiler_params=pltpu.CompilerParams(
            dimension_semantics=("parallel",)),                     # megacore on v7x
    )(p_arr, x3)


def gem_forward(x_nchw, p=3.0, eps=1e-6):
    """GeM.forward(x) for a PyTorch-layout (N, C, H, W) input. Returns (N, C, 1, 1)."""
    n, c, h, w = x_nchw.shape
    # One layout change to channels-last so C sits on the lane axis inside the kernel.
    # If your producer is already NHWC (typical in JAX), call gem_pooling_nhwc directly.
    x_nhwc = jnp.transpose(x_nchw, (0, 2, 3, 1))
    pooled = gem_pooling_nhwc(x_nhwc, p, eps=eps)         # (N, C)
    return pooled.reshape(n, c, 1, 1)                     # match F.avg_pool2d output shape


def _reference_nchw(x_nchw, p, eps):
    """Pure-JAX reference mirroring the PyTorch gem()."""
    xf = x_nchw.astype(jnp.float32)
    xp = jnp.power(jnp.maximum(xf, eps), p)
    pooled = jnp.mean(xp, axis=(2, 3))
    out = jnp.power(pooled, 1.0 / p)
    n, c = out.shape
    return out.reshape(n, c, 1, 1)


if __name__ == "__main__":
    # Small deterministic feature map (stand-in for a backbone output), NCHW like PyTorch.
    N, C, H, W = 4, 256, 8, 8
    key = jax.random.PRNGKey(0)
    feat = jax.random.normal(key, (N, C, H, W), dtype=jnp.float32)
    p_val = 3.0
    eps = 1e-6

    # f32 path
    out = gem_forward(feat, p=p_val, eps=eps)
    out = jax.block_until_ready(out)
    ref = _reference_nchw(feat, p_val, eps)
    assert out.shape == (N, C, 1, 1)
    assert jnp.allclose(out, ref, atol=1e-5, rtol=1e-4), "f32 mismatch vs reference"

    # bf16 input path (f32 accumulation inside the kernel, output in bf16)
    feat_bf16 = feat.astype(jnp.bfloat16)
    out_bf16 = gem_forward(feat_bf16, p=p_val, eps=eps)
    out_bf16 = jax.block_until_ready(out_bf16)
    ref_bf16 = _reference_nchw(feat_bf16.astype(jnp.float32), p_val, eps)
    assert out_bf16.dtype == jnp.bfloat16
    assert jnp.allclose(out_bf16.astype(jnp.float32), ref_bf16, atol=3e-2, rtol=3e-2), \
        "bf16 mismatch vs reference"

    print("KERNEL_OK")
</pallas_src>

<mosaic_0001>
module attributes {stable_mosaic.version = 11 : i64} {
  func.func @_gem_kernel(%arg0: i32, %arg1: memref<1xf32, #tpu.memory_space<smem>>, %arg2: memref<4x64x256xf32, #tpu.memory_space<vmem>>, %arg3: memref<4x256xf32, #tpu.memory_space<vmem>>) attributes {dimension_semantics = [#tpu.dimension_semantics<parallel>], iteration_bounds = array<i64: 1>, scalar_prefetch = 0 : i64, scratch_operands = 0 : i64, tpu.core_type = #tpu.core_type<tc>, window_params = [{transform_indices = @transform_0, window_bounds = array<i64: 1>}, {transform_indices = @transform_1, window_bounds = array<i64: 4, 64, 256>}, {transform_indices = @transform_2, window_bounds = array<i64: 4, 256>}]} {
    %c0 = arith.constant 0 : index
    %0 = memref.load %arg1[%c0] : memref<1xf32, #tpu.memory_space<smem>>
    %c0_0 = arith.constant 0 : index
    %c0_1 = arith.constant 0 : index
    %c0_2 = arith.constant 0 : index
    %1 = vector.load %arg2[%c0_0, %c0_1, %c0_2] : memref<4x64x256xf32, #tpu.memory_space<vmem>>, vector<4x64x256xf32>
    %cst = arith.constant 9.99999997E-7 : f32
    %2 = vector.broadcast %cst : f32 to vector<4x64x256xf32>
    %3 = arith.maximumf %1, %2 : vector<4x64x256xf32>
    %4 = math.log %3 : vector<4x64x256xf32>
    %5 = vector.broadcast %0 : f32 to vector<4x64x256xf32>
    %6 = arith.mulf %4, %5 : vector<4x64x256xf32>
    %7 = math.exp %6 : vector<4x64x256xf32>
    %cst_3 = arith.constant dense<0.000000e+00> : vector<4x256xf32>
    %8 = vector.multi_reduction <add>, %7, %cst_3 [1] : vector<4x64x256xf32> to vector<4x256xf32>
    %cst_4 = arith.constant 1.562500e-02 : f32
    %9 = vector.broadcast %cst_4 : f32 to vector<4x256xf32>
    %10 = arith.mulf %8, %9 : vector<4x256xf32>
    %11 = math.log %10 : vector<4x256xf32>
    %12 = vector.broadcast %0 : f32 to vector<4x256xf32>
    %13 = arith.divf %11, %12 : vector<4x256xf32>
    %14 = math.exp %13 : vector<4x256xf32>
    %c0_5 = arith.constant 0 : index
    %c0_6 = arith.constant 0 : index
    %15 = vector.load %arg3[%c0_5, %c0_6] : memref<4x256xf32, #tpu.memory_space<vmem>>, vector<4x256xf32>
    tpu.vector_store %arg3[%c0_5, %c0_6], %14 {strides = array<i32>} : memref<4x256xf32, #tpu.memory_space<vmem>>, vector<4x256xf32>,
    return
  }
  func.func @transform_0(%arg0: i32) -> i32 {
    %c0_i32 = arith.constant 0 : i32
    %c0_i32_0 = arith.constant 0 : i32
    return %c0_i32 : i32
  }
  func.func @transform_1(%arg0: i32) -> (i32, i32, i32) {
    %c0_i32 = arith.constant 0 : i32
    %c0_i32_0 = arith.constant 0 : i32
    %c0_i32_1 = arith.constant 0 : i32
    return %arg0, %c0_i32, %c0_i32_0 : i32, i32, i32
  }
  func.func @transform_2(%arg0: i32) -> (i32, i32) {
    %c0_i32 = arith.constant 0 : i32
    %c0_i32_0 = arith.constant 0 : i32
    return %arg0, %c0_i32 : i32, i32
  }
}

</mosaic_0001>

<bundles_post_ra>
// kernel: tpu_custom_call.1
= control target key start
LH: loop header
LB: loop body
LE: loop exit
PB: predicated region body
PF: predicated region fallthrough
CT: control target
= control target key end

     0   :  { %8 = vsyncpa [#allocation4], 0  ;;  %s1791_s0 = inlined_call_operand.<no memory space> [shape: f32[1], index: 0, kind: input, shape index: {}]   ;;  %s1792_s1 = inlined_call_operand.hbm [shape: f32[4,64,256], index: 1, kind: input, shape index: {}]   ;;  %s1793_s2 = inlined_call_operand.hbm [shape: f32[4,256], index: 2, kind: output, shape index: {}]  }
   0x1   :  { %9 = vsyncpa [#allocation5], 0  ;;  %s16_s11 = sshll.u32 %s1792_s1, 4  ;;  %s1042_s12 = smov [#allocation3]   ;;  %s17_s11 = int_to_ptr.hbm [resolvable:$true] %s16_s11 }
   0x2   :  { %s18_s13 = sshll.u32 %s1042_s12, 4  ;;  %s1043_s14 = smov 256   ;;  %s19_s13 = int_to_ptr.vmem [resolvable:$true] %s18_s13 }
   0x3   :  { %s1044_s15 = smov 16  }
   0x4   :  { %24 = dma.hbm_to_vmem [thread:$0]  %s17_s11, 8192, %s19_s13, [#allocation4], %s1043_s14, %s1043_s14, %s1044_s15  }
   0x5   :  { %1038 = dma.done.wait [#allocation4], 8192  }
   0x6   :  { %1039 = vsyncadd [#allocation4], 4294959104  ;;  %v30_v0 = vld [vmem:[#allocation3] sm:$0xff]  ;;  %v31_v1 = vld [vmem:[#allocation3 + $0x8] sm:$0xff]  ;;  %vm657_vm4 = vcmask 1043456   ;;  %vm663_vm5 = vcmask 1041409  }
   0x7   :  { %v32_v2 = vld [vmem:[#allocation3 + $0x10] sm:$0xff]  ;;  %v33_v3 = vld [vmem:[#allocation3 + $0x18] sm:$0xff]  ;;  %v94_v4 = vmax.f32 %v30_v0, 1e-06  ;;  %v34_v5 = vld [vmem:[#allocation3 + $0x20] sm:$0xff]  ;;  %vm665_vm6 = vcmask 1045509  }
   0x8   :  { %v95_v6 = vmax.f32 %v31_v1, 1e-06  ;;  %v35_v7 = vld [vmem:[#allocation3 + $0x28] sm:$0xff]  ;;  %v96_v8 = vmax.f32 %v32_v2, 1e-06  ;;  %v36_v9 = vld [vmem:[#allocation3 + $0x30] sm:$0xff] }
   0x9   :  { %v97_v10 = vmax.f32 %v33_v3, 1e-06  ;;  %v37_v11 = vld [vmem:[#allocation3 + $0x38] sm:$0xff]  ;;  %v98_v12 = vmax.f32 %v34_v5, 1e-06  ;;  %700 = vlog2.f32 %v94_v4  ;;  %v38_v13 = vld [vmem:[#allocation3 + $0x40] sm:$0xff] }
   0xa   :  { %v99_v14 = vmax.f32 %v35_v7, 1e-06  ;;  %702 = vlog2.f32 %v95_v6  ;;  %v39_v15 = vld [vmem:[#allocation3 + $0x48] sm:$0xff]  ;;  %v100_v16 = vmax.f32 %v36_v9, 1e-06  ;;  %v40_v17 = vld [vmem:[#allocation3 + $0x50] sm:$0xff] }
   0xb   :  { %704 = vlog2.f32 %v96_v8  ;;  %v101_v18 = vmax.f32 %v37_v11, 1e-06  ;;  %v41_v19 = vld [vmem:[#allocation3 + $0x58] sm:$0xff]  ;;  %v102_v20 = vmax.f32 %v38_v13, 1e-06  ;;  %v42_v21 = vld [vmem:[#allocation3 + $0x60] sm:$0xff] }
   0xc   :  { %706 = vlog2.f32 %v97_v10  ;;  %v103_v22 = vmax.f32 %v39_v15, 1e-06  ;;  %v43_v24 = vld [vmem:[#allocation3 + $0x68] sm:$0xff]  ;;  %v104_v25 = vmax.f32 %v40_v17, 1e-06  ;;  %v44_v27 = vld [vmem:[#allocation3 + $0x70] sm:$0xff] }
   0xd   :  { %708 = vlog2.f32 %v98_v12  ;;  %v105_v28 = vmax.f32 %v41_v19, 1e-06  ;;  %v45_v30 = vld [vmem:[#allocation3 + $0x78] sm:$0xff]  ;;  %v106_v31 = vmax.f32 %v42_v21, 1e-06  ;;  %v46_v33 = vld [vmem:[#allocation3 + $0x80] sm:$0xff] }
   0xe   :  { %710 = vlog2.f32 %v99_v14  ;;  %v107_v34 = vmax.f32 %v43_v24, 1e-06  ;;  %v47_v36 = vld [vmem:[#allocation3 + $0x88] sm:$0xff]  ;;  %v108_v37 = vmax.f32 %v44_v27, 1e-06  ;;  %v48_v39 = vld [vmem:[#allocation3 + $0x90] sm:$0xff] }
   0xf   :  { %v1064_v23 = vpop.eup %700  ;;  %712 = vlog2.f32 %v100_v16  ;;  %v109_v40 = vmax.f32 %v45_v30, 1e-06  ;;  %v49_v42 = vld [vmem:[#allocation3 + $0x98] sm:$0xff]  ;;  %v110_v43 = vmax.f32 %v46_v33, 1e-06  ;;  %v50_v45 = vld [vmem:[#allocation3 + $0xa0] sm:$0xff] }
  0x10   :  { %v1066_v26 = vpop.eup %702  ;;  %714 = vlog2.f32 %v101_v18  ;;  %v111_v46 = vmax.f32 %v47_v36, 1e-06  ;;  %v51_v48 = vld [vmem:[#allocation3 + $0xa8] sm:$0xff]  ;;  %v112_v49 = vmax.f32 %v48_v39, 1e-06  ;;  %v52_v51 = vld [vmem:[#allocation3 + $0xb0] sm:$0xff] }
  0x11   :  { %v1068_v29 = vpop.eup %704  ;;  %716 = vlog2.f32 %v102_v20  ;;  %v113_v52 = vmax.f32 %v49_v42, 1e-06  ;;  %v53_v54 = vld [vmem:[#allocation3 + $0xb8] sm:$0xff]  ;;  %v114_v55 = vmax.f32 %v50_v45, 1e-06  ;;  %v54_v57 = vld [vmem:[#allocation3 + $0xc0] sm:$0xff] }
  0x12   :  { %v1070_v32 = vpop.eup %706  ;;  %718 = vlog2.f32 %v103_v22  ;;  %v115_v58 = vmax.f32 %v51_v48, 1e-06  ;;  %v55_v60 = vld [vmem:[#allocation3 + $0xc8] sm:$0xff]  ;;  %v56_v61 = vld [vmem:[#allocation3 + $0xd0] sm:$0xff]  ;;  %v1090_v62 = vld [vmem:[#allocation3 + $0xd8] sm:$0xff]  ;;  %vm668_vm7 = vcmask 1042434  }
  0x13   :  { %v1072_v35 = vpop.eup %708  ;;  %720 = vlog2.f32 %v104_v25  ;;  %v116_v63 = vmax.f32 %v52_v51, 1e-06  ;;  %v1094_v1 = vld [vmem:[#allocation3 + $0xe0] sm:$0xff]  ;;  %v1096_v2 = vld [vmem:[#allocation3 + $0xe8] sm:$0xff]  ;;  %v1098_v3 = vld [vmem:[#allocation3 + $0xf0] sm:$0xff]  ;;  %vm670_vm8 = vcmask 1046534  }
  0x14   :  { %v1074_v38 = vpop.eup %710  ;;  %722 = vlog2.f32 %v105_v28  ;;  %v117_v4 = vmax.f32 %v53_v54, 1e-06  ;;  %v1102_v6 = vld [vmem:[#allocation3 + $0xf8] sm:$0xff]  ;;  %v1104_v7 = vld [vmem:[#allocation3 + $0x100] sm:$0xff]  ;;  %v1106_v8 = vld [vmem:[#allocation3 + $0x108] sm:$0xff]  ;;  %vm673_vm9 = vcmask 1043459  }
  0x15   :  { %v1076_v41 = vpop.eup %712  ;;  %724 = vlog2.f32 %v106_v31  ;;  %v118_v9 = vmax.f32 %v54_v57, 1e-06  ;;  %v1110_v11 = vld [vmem:[#allocation3 + $0x110] sm:$0xff]  ;;  %v1112_v12 = vld [vmem:[#allocation3 + $0x118] sm:$0xff]  ;;  %v1114_v13 = vld [vmem:[#allocation3 + $0x120] sm:$0xff]  ;;  %s686_s20 = sshll.u32 %s1793_s2, 4  ;;  %s687_s20 = int_to_ptr.hbm [resolvable:$true] %s686_s20 }
  0x16   :  { %v1078_v44 = vpop.eup %714  ;;  %726 = vlog2.f32 %v107_v34  ;;  %v119_v14 = vmax.f32 %v55_v60, 1e-06  ;;  %v1118_v16 = vld [vmem:[#allocation3 + $0x128] sm:$0xff]  ;;  %v1120_v17 = vld [vmem:[#allocation3 + $0x130] sm:$0xff]  ;;  %v1122_v18 = vld [vmem:[#allocation3 + $0x138] sm:$0xff]  ;;  %vm675_vm10 = vcmask 1047559  }
  0x17   :  { %v1080_v47 = vpop.eup %716  ;;  %728 = vlog2.f32 %v108_v37  ;;  %v120_v19 = vmax.f32 %v56_v61, 1e-06  ;;  %v1126_v21 = vld [vmem:[#allocation3 + $0x140] sm:$0xff]  ;;  %v1128_v22 = vld [vmem:[#allocation3 + $0x148] sm:$0xff]  ;;  %v1130_v24 = vld [vmem:[#allocation3 + $0x150] sm:$0xff] }
  0x18   :  { %v1082_v50 = vpop.eup %718  ;;  %730 = vlog2.f32 %v109_v40  ;;  %v121_v25 = vmax.f32 %v1090_v62, 1e-06  ;;  %v1135_v28 = vld [vmem:[#allocation3 + $0x158] sm:$0xff]  ;;  %v1137_v30 = vld [vmem:[#allocation3 + $0x160] sm:$0xff]  ;;  %v1139_v31 = vld [vmem:[#allocation3 + $0x168] sm:$0xff] }
  0x19   :  { %v1084_v53 = vpop.eup %720  ;;  %732 = vlog2.f32 %v110_v43  ;;  %1800 = vst [vmem:[#allocation9_spill] sm:$0xff] %v1137_v30  ;;  %v122_v33 = vmax.f32 %v1094_v1, 1e-06  ;;  %v123_v34 = vmax.f32 %v1096_v2, 1e-06  ;;  %v1146_v39 = vld [vmem:[#allocation3 + $0x170] sm:$0xff] }
  0x1a   :  { %v1086_v56 = vpop.eup %722  ;;  %734 = vlog2.f32 %v111_v46  ;;  %1801 = vst [vmem:[#allocation10_spill] sm:$0xff] %v1139_v31  ;;  %v124_v36 = vmax.f32 %v1098_v3, 1e-06  ;;  %v1148_v40 = vld [vmem:[#allocation3 + $0x178] sm:$0xff]  ;;  %v1150_v42 = vld [vmem:[#allocation3 + $0x180] sm:$0xff]  ;;  %v1159_v51 = vld [vmem:[#allocation3 + $0x190] sm:$0xff] }
  0x1b   :  { %v1088_v59 = vpop.eup %724  ;;  %736 = vlog2.f32 %v112_v49  ;;  %v125_v43 = vmax.f32 %v1102_v6, 1e-06  ;;  %v126_v45 = vmax.f32 %v1104_v7, 1e-06  ;;  %v127_v46 = vmax.f32 %v1106_v8, 1e-06 }
  0x1c   :  { %v1092_v0 = vpop.eup %726  ;;  %738 = vlog2.f32 %v113_v52  ;;  %v1157_v49 = vld [vmem:[#allocation3 + $0x188] sm:$0xff]  ;;  %v1161_v52 = vld [vmem:[#allocation3 + $0x198] sm:$0xff]  ;;  %v128_v54 = vmax.f32 %v1110_v11, 1e-06  ;;  %v130_v57 = vmax.f32 %v1114_v13, 1e-06 }
  0x1d   :  { %v1100_v5 = vpop.eup %728  ;;  %740 = vlog2.f32 %v114_v55  ;;  %v129_v55 = vmax.f32 %v1112_v12, 1e-06  ;;  %v1168_v60 = vld [vmem:[#allocation3 + $0x1a0] sm:$0xff]  ;;  %v1170_v61 = vld [vmem:[#allocation3 + $0x1a8] sm:$0xff]  ;;  %v1172_v62 = vld [vmem:[#allocation3 + $0x1b0] sm:$0xff] }
  0x1e   :  { %v1108_v10 = vpop.eup %730  ;;  %742 = vlog2.f32 %v115_v58  ;;  %v1181_v6 = vld [vmem:[#allocation3 + $0x1c0] sm:$0xff]  ;;  %v1183_v7 = vld [vmem:[#allocation3 + $0x1c8] sm:$0xff]  ;;  %v1190_v13 = vld [vmem:[#allocation3 + $0x1d0] sm:$0xff]  ;;  %v1228_v2 = vmul.f32 0.6931472, %v1064_v23 }
  0x1f   :  { %v1116_v15 = vpop.eup %732  ;;  %744 = vlog2.f32 %v116_v63  ;;  %v131_v63 = vmax.f32 %v1118_v16, 1e-06  ;;  %v1194_v16 = vld [vmem:[#allocation3 + $0x1e0] sm:$0xff]  ;;  %v1205_v11 = vld [vmem:[#allocation3 + $0x1f8] sm:$0xff]  ;;  %v1237_v30 = vmul.f32 0.6931472, %v1070_v32 }
  0x20   :  { %v1124_v20 = vpop.eup %734  ;;  %746 = vlog2.f32 %v117_v4  ;;  %v1179_v4 = vld [vmem:[#allocation3 + $0x1b8] sm:$0xff]  ;;  %1806 = vst [vmem:[#allocation15_spill] sm:$0xff] %v1205_v11  ;;  %v1807_v32 = vmax.f32 %v1120_v17, 1e-06  ;;  %v1271_v17 = vmul.f32 0.6931472, %v1092_v0 }
  0x21   :  { %v1133_v27 = vpop.eup %736  ;;  %748 = vlog2.f32 %v118_v9  ;;  %v1201_v9 = vld [vmem:[#allocation3 + $0x1e8] sm:$0xff] }
  0x22   :  { %v1144_v37 = vpop.eup %738  ;;  %750 = vlog2.f32 %v119_v14  ;;  %v1192_v14 = vld [vmem:[#allocation3 + $0x1d8] sm:$0xff] }
  0x23   :  { %v1155_v48 = vpop.eup %740  ;;  %752 = vlog2.f32 %v120_v19 }
  0x24   :  { %v1166_v58 = vpop.eup %742  ;;  %754 = vlog2.f32 %v121_v25 }
  0x25   :  { %v1177_v3 = vpop.eup %744  ;;  %756 = vlog2.f32 %v122_v33  ;;  %v1203_v33 = vld [vmem:[#allocation3 + $0x1f0] sm:$0xff] }
  0x26   :  { %1802 = vst [vmem:[#allocation11_spill] sm:$0xff] %v1177_v3  ;;  %v1188_v12 = vpop.eup %746  ;;  %758 = vlog2.f32 %v123_v34 }
  0x27   :  { %1803 = vst [vmem:[#allocation12_spill] sm:$0xff] %v1188_v12  ;;  %v1199_v8 = vpop.eup %748  ;;  %760 = vlog2.f32 %v124_v36  ;;  %v1246_v36 = vmul.f32 0.6931472, %v1076_v41  ;;  %v1808_v41 = vmax.f32 %v1122_v18, 1e-06 }
  0x28   :  { %1804 = vst [vmem:[#allocation13_spill] sm:$0xff] %v1199_v8  ;;  %v1210_v19 = vpop.eup %750  ;;  %762 = vlog2.f32 %v125_v43  ;;  %v1234_v43 = vmul.f32 0.6931472, %v1068_v29  ;;  %v1252_v29 = vmul.f32 0.6931472, %v1080_v47 }
  0x29   :  { %1805 = vst [vmem:[#allocation14_spill] sm:$0xff] %v1203_v33  ;;  %v753_v31 = vpop.eup %752  ;;  %764 = vlog2.f32 %v126_v45  ;;  %v1240_v45 = vmul.f32 0.6931472, %v1072_v35  ;;  %v1257_v35 = vmul.f32 0.6931472, %v1082_v50 }
  0x2a   :  { %v755_v12 = vpop.eup %754  ;;  %766 = vlog2.f32 %v127_v46  ;;  %v1231_v46 = vmul.f32 0.6931472, %v1066_v26  ;;  %v1249_v26 = vmul.f32 0.6931472, %v1078_v44  ;;  %v1268_v47 = vmul.f32 0.6931472, %v1088_v59 }
  0x2b   :  { %v757_v34 = vpop.eup %756  ;;  %768 = vlog2.f32 %v128_v54  ;;  %v1809_v50 = vmax.f32 %v1126_v21, 1e-06  ;;  %v1282_v18 = vmul.f32 0.6931472, %v1116_v15  ;;  %v1810_v59 = vmax.f32 %v1128_v22, 1e-06 }
  0x2c   :  { %v759_v8 = vpop.eup %758  ;;  %770 = vlog2.f32 %v129_v55  ;;  %v1243_v55 = vmul.f32 0.6931472, %v1074_v38  ;;  %v1260_v38 = vmul.f32 0.6931472, %v1084_v53  ;;  %v1293_v21 = vmul.f32 0.6931472, %v1144_v37 }
  0x2d   :  { %v761_v3 = vpop.eup %760  ;;  %772 = vlog2.f32 %v130_v57  ;;  %v1812_v1 = vld [vmem:[#allocation11_spill] sm:$0xff] }
  0x2e   :  { %v763_v54 = vpop.eup %762  ;;  %774 = vlog2.f32 %v131_v63  ;;  %v1263_v63 = vmul.f32 0.6931472, %v1086_v56  ;;  %v1279_v56 = vmul.f32 0.6931472, %v1108_v10  ;;  %v1811_v10 = vmax.f32 %v1130_v24, 1e-06 }
  0x2f   :  { %v765_v23 = vpop.eup %764  ;;  %776 = vlog2.f32 %v1807_v32  ;;  %v1274_v32 = vmul.f32 0.6931472, %v1100_v5  ;;  %v1290_v5 = vmul.f32 0.6931472, %v1133_v27  ;;  %v1304_v22 = vmul.f32 0.6931472, %v1812_v1 }
  0x30   :  { %v767_v57 = vpop.eup %766  ;;  %778 = vlog2.f32 %v1808_v41  ;;  %v1285_v41 = vmul.f32 0.6931472, %v1124_v20  ;;  %v1301_v20 = vmul.f32 0.6931472, %v1166_v58  ;;  %v1816_v27 = vmax.f32 %v1135_v28, 1e-06 }
  0x31   :  { %v769_v44 = vpop.eup %768  ;;  %780 = vlog2.f32 %v1809_v50  ;;  %v1296_v50 = vmul.f32 0.6931472, %v1155_v48  ;;  %1813 = vst [vmem:[#allocation11_spill] sm:$0xff] %v1304_v22  ;;  %v1817_v11 = vld [vmem:[#allocation13_spill] sm:$0xff]  ;;  %v1315_v24 = vmul.f32 0.6931472, %v1210_v19 }
  0x32   :  { %v771_v53 = vpop.eup %770  ;;  %782 = vlog2.f32 %v1810_v59  ;;  %v1814_v59 = vld [vmem:[#allocation12_spill] sm:$0xff]  ;;  %v1312_v48 = vmul.f32 0.6931472, %v1817_v11  ;;  %v1819_v58 = vld [vmem:[#allocation9_spill] sm:$0xff]  ;;  %v1321_v22 = vmul.f32 0.6931472, %v755_v12 }
  0x33   :  { %v773_v0 = vpop.eup %772  ;;  %784 = vlog2.f32 %v1811_v10  ;;  %v1307_v25 = vmul.f32 0.6931472, %v1814_v59  ;;  %v1317_v10 = vmul.f32 0.6931472, %v753_v31  ;;  %v1820_v33 = vmax.f32 %v1819_v58, 1e-06 }
  0x34   :  { %v775_v15 = vpop.eup %774  ;;  %786 = vlog2.f32 %v1816_v27  ;;  %1818 = vst [vmem:[#allocation13_spill] sm:$0xff] %v1312_v48  ;;  %v1323_v59 = vmul.f32 0.6931472, %v757_v34  ;;  %v1821_v28 = vld [vmem:[#allocation10_spill] sm:$0xff]  ;;  %v1329_v48 = vmul.f32 0.6931472, %v761_v3 }
  0x35   :  { %1815 = vst [vmem:[#allocation12_spill] sm:$0xff] %v1307_v25  ;;  %v777_v37 = vpop.eup %776  ;;  %788 = vlog2.f32 %v1820_v33  ;;  %v1325_v25 = vmul.f32 0.6931472, %v759_v8  ;;  %v1822_v27 = vmax.f32 %v1821_v28, 1e-06 }
  0x36   :  { %v779_v1 = vpop.eup %778  ;;  %v1331_v19 = vmul.f32 0.6931472, %v763_v54  ;;  %v1333_v31 = vmul.f32 0.6931472, %v765_v23  ;;  %v1823_v58 = vmax.f32 %v1146_v39, 1e-06 }
  0x37   :  { %790 = vlog2.f32 %v1822_v27  ;;  %v781_v11 = vpop.eup %780  ;;  %v1337_v12 = vmul.f32 0.6931472, %v767_v57  ;;  %v1339_v34 = vmul.f32 0.6931472, %v769_v44  ;;  %v1341_v8 = vmul.f32 0.6931472, %v771_v53 }
  0x38   :  { %792 = vlog2.f32 %v1823_v58  ;;  %v783_v33 = vpop.eup %782  ;;  %v1824_v28 = vmax.f32 %v1148_v40, 1e-06  ;;  %v1345_v3 = vmul.f32 0.6931472, %v773_v0  ;;  %v1347_v54 = vmul.f32 0.6931472, %v775_v15 }
  0x39   :  { %v785_v27 = vpop.eup %784  ;;  %v1349_v23 = vmul.f32 0.6931472, %v777_v37  ;;  %v1825_v39 = vmax.f32 %v1150_v42, 1e-06  ;;  %v1353_v57 = vmul.f32 0.6931472, %v779_v1  ;;  %v1362_v40 = vstv %s1791_s0 }
  0x3a   :  { %794 = vlog2.f32 %v1824_v28  ;;  %v787_v58 = vpop.eup %786  ;;  %v1355_v44 = vmul.f32 0.6931472, %v781_v11  ;;  %v1826_v53 = vmax.f32 %v1157_v49, 1e-06  ;;  %1827 = vst [vmem:[#allocation9_spill] sm:$0xff] %v1362_v40  ;;  %v287_v42 = vmul.f32 %v1362_v40, %v1228_v2  ;;  %s1045_s0 = smov [#allocation6]  }
  0x3b   :  { %796 = vlog2.f32 %v1825_v39  ;;  %v789_v0 = vpop.eup %788  ;;  %v1364_v15 = vmul.f32 0.6931472, %v783_v33  ;;  %v1828_v37 = vmax.f32 %v1159_v51, 1e-06  ;;  %v288_v1 = vmul.f32 %v1362_v40, %v1231_v46  ;;  %s684_s17 = sshll.u32 %s1045_s0, 4  ;;  %s685_s17 = int_to_ptr.vmem [resolvable:$true] %s684_s17 }
  0x3c   :  { %798 = vlog2.f32 %v1826_v53  ;;  %v1372_v49 = vmul.f32 0.6931472, %v785_v27  ;;  %v1829_v28 = vmax.f32 %v1161_v52, 1e-06  ;;  %v289_v39 = vmul.f32 %v1362_v40, %v1234_v43 }
  0x3d   :  { %800 = vlog2.f32 %v1828_v37  ;;  %v791_v11 = vpop.eup %790  ;;  %v290_v33 = vmul.f32 %v1362_v40, %v1237_v30  ;;  %v1380_v53 = vmul.f32 0.6931472, %v787_v58  ;;  %v1830_v2 = vmax.f32 %v1168_v60, 1e-06 }
  0x3e   :  { %802 = vlog2.f32 %v1829_v28  ;;  %v793_v51 = vpop.eup %792  ;;  %v291_v46 = vmul.f32 %v1362_v40, %v1240_v45  ;;  %v1388_v27 = vmul.f32 %v1362_v40, %v1243_v55  ;;  %v1390_v37 = vmul.f32 0.6931472, %v789_v0 }
  0x3f   :  { %804 = vlog2.f32 %v1830_v2  ;;  %v1831_v43 = vmax.f32 %v1170_v61, 1e-06  ;;  %v1396_v30 = vmul.f32 %v1362_v40, %v1246_v36  ;;  %v1400_v60 = vmul.f32 %v1362_v40, %v1249_v26 }
  0x40   :  { %v795_v52 = vpop.eup %794  ;;  %v1402_v45 = vmul.f32 0.6931472, %v791_v11  ;;  %v1832_v55 = vmax.f32 %v1172_v62, 1e-06  ;;  %v1408_v0 = vmul.f32 %v1362_v40, %v1252_v29  ;;  %v1412_v61 = vmul.f32 %v1362_v40, %v1257_v35 }
  0x41   :  { %806 = vlog2.f32 %v1831_v43  ;;  %v797_v58 = vpop.eup %796  ;;  %v1414_v28 = vmul.f32 0.6931472, %v793_v51  ;;  %v1833_v26 = vmax.f32 %v1179_v4, 1e-06  ;;  %v1420_v11 = vmul.f32 %v1362_v40, %v1260_v38 }
  0x42   :  { %808 = vlog2.f32 %v1832_v55  ;;  %v799_v36 = vpop.eup %798  ;;  %v1424_v62 = vmul.f32 %v1362_v40, %v1263_v63  ;;  %v1426_v2 = vmul.f32 0.6931472, %v795_v52  ;;  %v1834_v35 = vmax.f32 %v1181_v6, 1e-06 }
  0x43   :  { %810 = vlog2.f32 %v1833_v26  ;;  %v801_v29 = vpop.eup %800  ;;  %v1432_v51 = vmul.f32 %v1362_v40, %v1268_v47  ;;  %v1436_v4 = vmul.f32 %v1362_v40, %v1271_v17  ;;  %v1438_v43 = vmul.f32 0.6931472, %v797_v58 }
  0x44   :  { %812 = vlog2.f32 %v1834_v35  ;;  %v803_v38 = vpop.eup %802  ;;  %v1835_v63 = vmax.f32 %v1183_v7, 1e-06  ;;  %v1444_v52 = vmul.f32 %v1362_v40, %v1274_v32  ;;  %v1448_v6 = vmul.f32 %v1362_v40, %v1279_v56 }
  0x45   :  { %v805_v47 = vpop.eup %804  ;;  %v1450_v55 = vmul.f32 0.6931472, %v799_v36  ;;  %v1836_v17 = vmax.f32 %v1190_v13, 1e-06  ;;  %v1456_v58 = vmul.f32 %v1362_v40, %v1282_v18  ;;  %v1460_v7 = vmul.f32 %v1362_v40, %v1285_v41 }
  0x46   :  { %814 = vlog2.f32 %v1835_v63  ;;  %v1462_v26 = vmul.f32 0.6931472, %v801_v29  ;;  %v1838_v56 = vmax.f32 %v1192_v14, 1e-06  ;;  %v1468_v36 = vmul.f32 %v1362_v40, %v1290_v5 }
  0x47   :  { %816 = vlog2.f32 %v1836_v17  ;;  %v807_v32 = vpop.eup %806  ;;  %v1472_v13 = vmul.f32 %v1362_v40, %v1293_v21  ;;  %v1474_v35 = vmul.f32 0.6931472, %v803_v38  ;;  %v1840_v41 = vmax.f32 %v1194_v16, 1e-06  ;;  %v1845_v17 = vld [vmem:[#allocation11_spill] sm:$0xff]  ;;  %v1847_v16 = vld [vmem:[#allocation12_spill] sm:$0xff] }
  0x48   :  { %1837 = vst [vmem:[#allocation10_spill] sm:$0xff] %v1462_v26  ;;  %818 = vlog2.f32 %v1838_v56  ;;  %v809_v18 = vpop.eup %808  ;;  %v1480_v29 = vmul.f32 %v1362_v40, %v1296_v50  ;;  %v1484_v14 = vmul.f32 %v1362_v40, %v1301_v20  ;;  %v1486_v63 = vmul.f32 0.6931472, %v805_v47 }
  0x49   :  { %1839 = vst [vmem:[#allocation16_spill] sm:$0xff] %v1474_v35  ;;  %820 = vlog2.f32 %v1840_v41  ;;  %v811_v5 = vpop.eup %810  ;;  %v1844_v21 = vmax.f32 %v1201_v9, 1e-06  ;;  %v1492_v38 = vmul.f32 %v1362_v40, %v1845_v17  ;;  %v1496_v56 = vmul.f32 %v1362_v40, %v1847_v16  ;;  %v1849_v41 = vld [vmem:[#allocation14_spill] sm:$0xff]  ;;  %v1853_v9 = vld [vmem:[#allocation13_spill] sm:$0xff] }
  0x4a   :  { %1841 = vst [vmem:[#allocation17_spill] sm:$0xff] %v1480_v29  ;;  %v813_v50 = vpop.eup %812  ;;  %v1850_v35 = vmax.f32 %v1849_v41, 1e-06  ;;  %v351_v20 = vmul.f32 1.442695, %v287_v42  ;;  %v1508_v17 = vmul.f32 %v1362_v40, %v1315_v24  ;;  %v1514_v42 = vmul.f32 %v1362_v40, %v1317_v10 }
  0x4b   :  { %1842 = vst [vmem:[#allocation18_spill] sm:$0xff] %v1484_v14  ;;  %822 = vlog2.f32 %v1844_v21  ;;  %v353_v14 = vmul.f32 1.442695, %v288_v1  ;;  %v355_v26 = vmul.f32 1.442695, %v289_v39  ;;  %v1504_v21 = vmul.f32 %v1362_v40, %v1853_v9 }
  0x4c   :  { %1843 = vst [vmem:[#allocation19_spill] sm:$0xff] %v1486_v63  ;;  %824 = vlog2.f32 %v1850_v35  ;;  %v815_v47 = vpop.eup %814  ;;  %v1851_v63 = vld [vmem:[#allocation15_spill] sm:$0xff]  ;;  %v357_v16 = vmul.f32 1.442695, %v290_v33  ;;  %v359_v1 = vmul.f32 1.442695, %v291_v46  ;;  %v1529_v10 = vmul.f32 %v1362_v40, %v1325_v25 }
  0x4d   :  { %1846 = vst [vmem:[#allocation11_spill] sm:$0xff] %v1492_v38  ;;  %v1852_v29 = vmax.f32 %v1851_v63, 1e-06  ;;  %v1510_v38 = vmul.f32 0.6931472, %v807_v32  ;;  %v1525_v32 = vmul.f32 %v1362_v40, %v1323_v59  ;;  %v1543_v25 = vmul.f32 %v1362_v40, %v1331_v19 }
  0x4e   :  { %1848 = vst [vmem:[#allocation12_spill] sm:$0xff] %v1496_v56  ;;  %v817_v56 = vpop.eup %816  ;;  %v1516_v35 = vmul.f32 0.6931472, %v809_v18  ;;  %v361_v24 = vmul.f32 1.442695, %v1388_v27 }
  0x4f   :  { %826 = vlog2.f32 %v1852_v29  ;;  %v819_v39 = vpop.eup %818  ;;  %v1520_v29 = vmul.f32 %v1362_v40, %v1321_v22  ;;  %v363_v46 = vmul.f32 1.442695, %v1396_v30  ;;  %v1532_v63 = vmul.f32 0.6931472, %v811_v5 }
  0x50   :  { %828 = vpow2.f32 %v351_v20  ;;  %v821_v33 = vpop.eup %820  ;;  %v1536_v22 = vmul.f32 %v1362_v40, %v1329_v48  ;;  %v365_v27 = vmul.f32 1.442695, %v1400_v60  ;;  %v1539_v59 = vmul.f32 0.6931472, %v813_v50 }
  0x51   :  { %830 = vpow2.f32 %v353_v14  ;;  %v823_v18 = vpop.eup %822  ;;  %v367_v30 = vmul.f32 1.442695, %v1408_v0  ;;  %v1550_v5 = vmul.f32 %v1362_v40, %v1333_v31  ;;  %v1554_v48 = vmul.f32 %v1362_v40, %v1337_v12 }
  0x52   :  { %832 = vpow2.f32 %v355_v26  ;;  %v825_v14 = vpop.eup %824  ;;  %v369_v60 = vmul.f32 1.442695, %v1412_v61  ;;  %v1559_v19 = vmul.f32 0.6931472, %v815_v47  ;;  %v1563_v0 = vmul.f32 %v1362_v40, %v1339_v34 }
  0x53   :  { %834 = vpow2.f32 %v357_v16  ;;  %v371_v41 = vmul.f32 1.442695, %v1420_v11  ;;  %v1570_v12 = vmul.f32 %v1362_v40, %v1341_v8  ;;  %v1574_v61 = vmul.f32 %v1362_v40, %v1345_v3 }
  0x54   :  { %836 = vpow2.f32 %v359_v1  ;;  %v373_v20 = vmul.f32 1.442695, %v1424_v62  ;;  %v1579_v34 = vmul.f32 0.6931472, %v817_v56  ;;  %v1583_v11 = vmul.f32 %v1362_v40, %v1347_v54 }
  0x55   :  { %v1546_v26 = vpop.eup %826  ;;  %838 = vpow2.f32 %v361_v24  ;;  %v375_v9 = vmul.f32 1.442695, %v1432_v51  ;;  %v1590_v3 = vmul.f32 %v1362_v40, %v1349_v23  ;;  %v1594_v62 = vmul.f32 %v1362_v40, %v1353_v57 }
  0x56   :  { %v1557_v50 = vpop.eup %828  ;;  %840 = vpow2.f32 %v363_v46  ;;  %v377_v56 = vmul.f32 1.442695, %v1436_v4  ;;  %v277_v54 = vmul.f32 0.6931472, %v819_v39  ;;  %v1601_v1 = vmul.f32 %v1362_v40, %v1355_v44 }
  0x57   :  { %v1566_v31 = vpop.eup %830  ;;  %842 = vpow2.f32 %v365_v27  ;;  %v379_v51 = vmul.f32 1.442695, %v1444_v52  ;;  %v1608_v23 = vmul.f32 %v1362_v40, %v1364_v15  ;;  %v1612_v57 = vmul.f32 %v1362_v40, %v1372_v49 }
  0x58   :  { %v1577_v47 = vpop.eup %832  ;;  %844 = vpow2.f32 %v367_v30  ;;  %v381_v4 = vmul.f32 1.442695, %v1448_v6  ;;  %v279_v44 = vmul.f32 0.6931472, %v821_v33  ;;  %v1619_v46 = vmul.f32 %v1362_v40, %v1380_v53 }
  0x59   :  { %v1586_v8 = vpop.eup %834  ;;  %846 = vpow2.f32 %v369_v60  ;;  %v383_v52 = vmul.f32 1.442695, %v1456_v58  ;;  %v1626_v15 = vmul.f32 %v1362_v40, %v1390_v37  ;;  %v1630_v49 = vmul.f32 %v1362_v40, %v1402_v45 }
  0x5a   :  { %v1597_v16 = vpop.eup %836  ;;  %848 = vpow2.f32 %v371_v41  ;;  %v385_v6 = vmul.f32 1.442695, %v1460_v7  ;;  %v281_v53 = vmul.f32 0.6931472, %v823_v18  ;;  %v1637_v30 = vmul.f32 %v1362_v40, %v1414_v28 }
  0x5b   :  { %v1604_v24 = vpop.eup %838  ;;  %850 = vpow2.f32 %v373_v20  ;;  %v387_v58 = vmul.f32 1.442695, %v1468_v36  ;;  %v1644_v37 = vmul.f32 %v1362_v40, %v1426_v2  ;;  %v1648_v45 = vmul.f32 %v1362_v40, %v1438_v43  ;;  %v1856_v36 = vld [vmem:[#allocation17_spill] sm:$0xff]  ;;  %v1857_v2 = vld [vmem:[#allocation10_spill] sm:$0xff]  ;;  %v1859_v43 = vld [vmem:[#allocation16_spill] sm:$0xff] }
  0x5c   :  { %v1615_v39 = vpop.eup %840  ;;  %852 = vpow2.f32 %v375_v9  ;;  %v389_v7 = vmul.f32 1.442695, %v1472_v13  ;;  %v283_v28 = vmul.f32 0.6931472, %v825_v14  ;;  %v1655_v41 = vmul.f32 %v1362_v40, %v1450_v55  ;;  %v1860_v13 = vld [vmem:[#allocation18_spill] sm:$0xff] }
  0x5d   :  { %v1622_v27 = vpop.eup %842  ;;  %854 = vpow2.f32 %v377_v56  ;;  %1854 = vst [vmem:[#allocation14_spill] sm:$0xff] %v1648_v45  ;;  %v391_v20 = vmul.f32 1.442695, %v1856_v36  ;;  %v1662_v56 = vmul.f32 %v1362_v40, %v1857_v2  ;;  %v393_v14 = vmul.f32 1.442695, %v1860_v13  ;;  %v1863_v13 = vld [vmem:[#allocation12_spill] sm:$0xff] }
  0x5e   :  { %v1633_v33 = vpop.eup %844  ;;  %856 = vpow2.f32 %v379_v51  ;;  %1855 = vst [vmem:[#allocation15_spill] sm:$0xff] %v1655_v41  ;;  %v1666_v51 = vmul.f32 %v1362_v40, %v1859_v43  ;;  %v285_v55 = vmul.f32 0.6931472, %v1546_v26  ;;  %v1862_v41 = vld [vmem:[#allocation11_spill] sm:$0xff]  ;;  %v1681_v43 = vmul.f32 %v1362_v40, %v1510_v38 }
  0x5f   :  { %v1640_v60 = vpop.eup %846  ;;  %858 = vpow2.f32 %v381_v4  ;;  %1858 = vst [vmem:[#allocation13_spill] sm:$0xff] %v1662_v56  ;;  %v395_v45 = vmul.f32 1.442695, %v1862_v41  ;;  %v397_v26 = vmul.f32 1.442695, %v1863_v13  ;;  %v1696_v41 = vmul.f32 %v1362_v40, %v1539_v59 }
  0x60   :  { %v1651_v18 = vpop.eup %848  ;;  %860 = vpow2.f32 %v383_v52  ;;  %v1861_v52 = vld [vmem:[#allocation19_spill] sm:$0xff]  ;;  %v399_v38 = vmul.f32 1.442695, %v1504_v21  ;;  %v1711_v59 = vmul.f32 %v1362_v40, %v277_v54  ;;  %v403_v21 = vmul.f32 1.442695, %v1514_v42 }
  0x61   :  { %v1658_v9 = vpop.eup %850  ;;  %862 = vpow2.f32 %v385_v6  ;;  %v1674_v36 = vmul.f32 %v1362_v40, %v1861_v52  ;;  %v1685_v6 = vmul.f32 %v1362_v40, %v1516_v35  ;;  %1864 = vst [vmem:[#allocation17_spill] sm:$0xff] %v1696_v41  ;;  %v1703_v35 = vmul.f32 %v1362_v40, %v1559_v19 }
  0x62   :  { %v1669_v4 = vpop.eup %852  ;;  %864 = vpow2.f32 %v387_v58  ;;  %v1692_v58 = vmul.f32 %v1362_v40, %v1532_v63  ;;  %v401_v63 = vmul.f32 1.442695, %v1508_v17  ;;  %v1718_v19 = vmul.f32 %v1362_v40, %v281_v53 }
  0x63   :  { %v1677_v2 = vpop.eup %854  ;;  %866 = vpow2.f32 %v389_v7  ;;  %v1707_v7 = vmul.f32 %v1362_v40, %v1579_v34  ;;  %v1721_v34 = vmul.f32 %v1362_v40, %v283_v28  ;;  %v405_v17 = vmul.f32 1.442695, %v1520_v29 }
  0x64   :  { %v1688_v56 = vpop.eup %856  ;;  %868 = vpow2.f32 %v391_v20  ;;  %v1714_v20 = vmul.f32 %v1362_v40, %v279_v44  ;;  %v1725_v54 = vmul.f32 %v1362_v40, %v285_v55  ;;  %v407_v44 = vmul.f32 1.442695, %v1525_v32 }
  0x65   :  { %v1699_v52 = vpop.eup %858  ;;  %870 = vpow2.f32 %v393_v14  ;;  %1865 = vst [vmem:[#allocation10_spill] sm:$0xff] %v1721_v34  ;;  %v492_v42 = vadd.f32 %v1586_v8, %v1566_v31  ;;  %v409_v53 = vmul.f32 1.442695, %v1529_v10  ;;  %v411_v28 = vmul.f32 1.442695, %v1536_v22 }
  0x66   :  { %v861_v13 = vpop.eup %860  ;;  %872 = vpow2.f32 %v395_v45  ;;  %v479_v29 = vadd.f32 %v1577_v47, %v1557_v50  ;;  %v413_v32 = vmul.f32 1.442695, %v1543_v25  ;;  %v415_v31 = vmul.f32 1.442695, %v1550_v5 }
  0x67   :  { %v863_v41 = vpop.eup %862  ;;  %874 = vpow2.f32 %v397_v26  ;;  %v493_v55 = vadd.f32 %v1604_v24, %v492_v42  ;;  %v417_v50 = vmul.f32 1.442695, %v1554_v48  ;;  %v419_v47 = vmul.f32 1.442695, %v1563_v0 }
  0x68   :  { %v865_v14 = vpop.eup %864  ;;  %876 = vpow2.f32 %v399_v38  ;;  %v480_v10 = vadd.f32 %v1597_v16, %v479_v29  ;;  %v421_v16 = vmul.f32 1.442695, %v1570_v12 }
  0x69   :  { %v867_v45 = vpop.eup %866  ;;  %878 = vpow2.f32 %v401_v63  ;;  %v505_v34 = vadd.f32 %v865_v14, %v861_v13  ;;  %v494_v22 = vadd.f32 %v1622_v27, %v493_v55 }
  0x6a   :  { %v869_v26 = vpop.eup %868  ;;  %880 = vpow2.f32 %v403_v21  ;;  %v518_v38 = vadd.f32 %v867_v45, %v863_v41  ;;  %v481_v25 = vadd.f32 %v1615_v39, %v480_v10  ;;  %v425_v39 = vmul.f32 1.442695, %v1583_v11 }
  0x6b   :  { %v871_v40 = vpop.eup %870  ;;  %882 = vpow2.f32 %v405_v17  ;;  %v506_v8 = vadd.f32 %v869_v26, %v505_v34  ;;  %v495_v5 = vadd.f32 %v1640_v60, %v494_v22  ;;  %v427_v60 = vmul.f32 1.442695, %v1590_v3 }
  0x6c   :  { %v873_v63 = vpop.eup %872  ;;  %884 = vpow2.f32 %v407_v44  ;;  %v519_v13 = vadd.f32 %v871_v40, %v518_v38  ;;  %v423_v40 = vmul.f32 1.442695, %v1574_v61  ;;  %v482_v48 = vadd.f32 %v1633_v33, %v481_v25  ;;  %v1867_v25 = vld [vmem:[#allocation15_spill] sm:$0xff] }
  0x6d   :  { %v875_v21 = vpop.eup %874  ;;  %886 = vpow2.f32 %v409_v53  ;;  %v507_v24 = vadd.f32 %v873_v63, %v506_v8  ;;  %v496_v0 = vadd.f32 %v1658_v9, %v495_v5  ;;  %v429_v33 = vmul.f32 1.442695, %v1594_v62 }
  0x6e   :  { %v877_v41 = vpop.eup %876  ;;  %888 = vpow2.f32 %v411_v28  ;;  %v520_v34 = vadd.f32 %v875_v21, %v519_v13  ;;  %v483_v12 = vadd.f32 %v1651_v18, %v482_v48  ;;  %v431_v9 = vmul.f32 1.442695, %v1601_v1 }
  0x6f   :  { %v879_v17 = vpop.eup %878  ;;  %890 = vpow2.f32 %v413_v32  ;;  %v508_v27 = vadd.f32 %v877_v41, %v507_v24  ;;  %v497_v61 = vadd.f32 %v1677_v2, %v496_v0  ;;  %v433_v18 = vmul.f32 1.442695, %v1608_v23 }
  0x70   :  { %v881_v14 = vpop.eup %880  ;;  %892 = vpow2.f32 %v415_v31  ;;  %v521_v44 = vadd.f32 %v879_v17, %v520_v34  ;;  %v484_v11 = vadd.f32 %v1669_v4, %v483_v12  ;;  %v435_v2 = vmul.f32 1.442695, %v1612_v57 }
  0x71   :  { %v883_v42 = vpop.eup %882  ;;  %894 = vpow2.f32 %v417_v50  ;;  %v509_v45 = vadd.f32 %v881_v14, %v508_v27  ;;  %v498_v3 = vadd.f32 %v1699_v52, %v497_v61  ;;  %v437_v62 = vmul.f32 1.442695, %v1619_v46  ;;  %v1868_v27 = vld [vmem:[#allocation13_spill] sm:$0xff] }
  0x72   :  { %v885_v53 = vpop.eup %884  ;;  %896 = vpow2.f32 %v419_v47  ;;  %v522_v28 = vadd.f32 %v883_v42, %v521_v44  ;;  %v485_v1 = vadd.f32 %v1688_v56, %v484_v11  ;;  %v439_v4 = vmul.f32 1.442695, %v1626_v15  ;;  %v1866_v47 = vld [vmem:[#allocation14_spill] sm:$0xff]  ;;  %v1869_v11 = vld [vmem:[#allocation17_spill] sm:$0xff] }
  0x73   :  { %v887_v26 = vpop.eup %886  ;;  %898 = vpow2.f32 %v421_v16  ;;  %v510_v29 = vadd.f32 %v885_v53, %v509_v45  ;;  %v441_v52 = vmul.f32 1.442695, %v1630_v49  ;;  %v443_v22 = vmul.f32 1.442695, %v1637_v30 }
  0x74   :  { %v889_v55 = vpop.eup %888  ;;  %900 = vpow2.f32 %v423_v40  ;;  %v523_v38 = vadd.f32 %v887_v26, %v522_v28  ;;  %v486_v23 = vrot.slane %v485_v1, 4  ;;  %v499_v57 = vrot.slane %v498_v3, 4 }
  0x75   :  { %v891_v32 = vpop.eup %890  ;;  %902 = vpow2.f32 %v425_v39  ;;  %v511_v31 = vadd.f32 %v889_v55, %v510_v29  ;;  %v445_v46 = vmul.f32 1.442695, %v1644_v37  ;;  %v447_v56 = vmul.f32 1.442695, %v1866_v47 }
  0x76   :  { %v893_v8 = vpop.eup %892  ;;  %904 = vpow2.f32 %v427_v60  ;;  %v524_v63 = vadd.f32 %v891_v32, %v523_v38  ;;  %v449_v15 = vmul.f32 1.442695, %v1867_v25  ;;  %v487_v5 = vadd.f32 %v486_v23, %v485_v1 }
  0x77   :  { %v895_v10 = vpop.eup %894  ;;  %906 = vpow2.f32 %v429_v33  ;;  %v512_v21 = vrot.slane %v511_v31, 4  ;;  %v453_v30 = vmul.f32 1.442695, %v1666_v51  ;;  %v451_v14 = vmul.f32 1.442695, %v1868_v27 }
  0x78   :  { %v897_v13 = vpop.eup %896  ;;  %908 = vpow2.f32 %v431_v9  ;;  %v525_v49 = vrot.slane %v524_v63, 4  ;;  %v500_v37 = vadd.f32 %v499_v57, %v498_v3  ;;  %v455_v44 = vmul.f32 1.442695, %v1674_v36 }
  0x79   :  { %v899_v50 = vpop.eup %898  ;;  %910 = vpow2.f32 %v433_v18  ;;  %v531_v24 = vadd.f32 %v897_v13, %v893_v8  ;;  %v513_v48 = vadd.f32 %v512_v21, %v511_v31  ;;  %v457_v45 = vmul.f32 1.442695, %v1681_v43 }
  0x7a   :  { %v901_v41 = vpop.eup %900  ;;  %912 = vpow2.f32 %v435_v2  ;;  %v544_v16 = vadd.f32 %v899_v50, %v895_v10  ;;  %v488_v53 = vrot.slane %v487_v5, 2  ;;  %v526_v51 = vadd.f32 %v525_v49, %v524_v63 }
  0x7b   :  { %v903_v34 = vpop.eup %902  ;;  %914 = vpow2.f32 %v437_v62  ;;  %v532_v17 = vadd.f32 %v901_v41, %v531_v24  ;;  %v459_v61 = vmul.f32 1.442695, %v1685_v6  ;;  %v461_v9 = vmul.f32 1.442695, %v1692_v58 }
  0x7c   :  { %v905_v40 = vpop.eup %904  ;;  %916 = vpow2.f32 %v439_v4  ;;  %v545_v39 = vadd.f32 %v903_v34, %v544_v16  ;;  %v501_v29 = vrot.slane %v500_v37, 2  ;;  %v514_v36 = vrot.slane %v513_v48, 2 }
  0x7d   :  { %v907_v0 = vpop.eup %906  ;;  %918 = vpow2.f32 %v441_v52  ;;  %v533_v42 = vadd.f32 %v905_v40, %v532_v17  ;;  %v463_v3 = vmul.f32 1.442695, %v1869_v11  ;;  %v465_v18 = vmul.f32 1.442695, %v1703_v35 }
  0x7e   :  { %v909_v60 = vpop.eup %908  ;;  %920 = vpow2.f32 %v443_v22  ;;  %v546_v26 = vadd.f32 %v907_v0, %v545_v39  ;;  %v489_v2 = vadd.f32 %v488_v53, %v487_v5  ;;  %v527_v6 = vrot.slane %v526_v51, 2 }
  0x7f   :  { %v911_v12 = vpop.eup %910  ;;  %922 = vpow2.f32 %v445_v46  ;;  %v534_v28 = vadd.f32 %v909_v60, %v533_v42  ;;  %v467_v8 = vmul.f32 1.442695, %v1707_v7  ;;  %v469_v63 = vmul.f32 1.442695, %v1711_v59  ;;  %v1870_v46 = vld [vmem:[#allocation10_spill] sm:$0xff] }
  0x80   :  { %v913_v33 = vpop.eup %912  ;;  %924 = vpow2.f32 %v447_v56  ;;  %v547_v43 = vadd.f32 %v911_v12, %v546_v26  ;;  %v502_v10 = vadd.f32 %v501_v29, %v500_v37  ;;  %v515_v4 = vadd.f32 %v514_v36, %v513_v48 }
  0x81   :  { %v915_v55 = vpop.eup %914  ;;  %926 = vpow2.f32 %v449_v15  ;;  %v535_v38 = vadd.f32 %v913_v33, %v534_v28  ;;  %v471_v22 = vmul.f32 1.442695, %v1714_v20  ;;  %v473_v57 = vmul.f32 1.442695, %v1718_v19 }
  0x82   :  { %v917_v32 = vpop.eup %916  ;;  %928 = vpow2.f32 %v451_v14  ;;  %v548_v58 = vadd.f32 %v915_v55, %v547_v43  ;;  %v490_v21 = vrot.slane %v489_v2, 1  ;;  %v528_v7 = vadd.f32 %v527_v6, %v526_v51 }
  0x83   :  { %v919_v31 = vpop.eup %918  ;;  %930 = vpow2.f32 %v453_v30  ;;  %v536_v62 = vadd.f32 %v917_v32, %v535_v38  ;;  %v475_v47 = vmul.f32 1.442695, %v1870_v46  ;;  %v477_v41 = vmul.f32 1.442695, %v1725_v54 }
  0x84   :  { %v921_v1 = vpop.eup %920  ;;  %932 = vpow2.f32 %v455_v44  ;;  %v549_v35 = vadd.f32 %v919_v31, %v548_v58  ;;  %v503_v25 = vrot.slane %v502_v10, 1  ;;  %v516_v20 = vrot.slane %v515_v4, 1 }
  0x85   :  { %v923_v52 = vpop.eup %922  ;;  %934 = vpow2.f32 %v457_v45  ;;  %v537_v13 = vadd.f32 %v921_v1, %v536_v62  ;;  %v491_v30 = vadd.f32 %v490_v21, %v489_v2  ;;  %v529_v17 = vrot.slane %v528_v7, 1 }
  0x86   :  { %v925_v23 = vpop.eup %924  ;;  %936 = vpow2.f32 %v459_v61  ;;  %v550_v59 = vadd.f32 %v923_v52, %v549_v35  ;;  %v504_v54 = vadd.f32 %v503_v25, %v502_v10  ;;  %v517_v0 = vadd.f32 %v516_v20, %v515_v4  ;;  %v1871_v10 = vld [vmem:[#allocation9_spill] sm:$0xff] }
  0x87   :  { %v927_v50 = vpop.eup %926  ;;  %938 = vpow2.f32 %v461_v9  ;;  %v538_v56 = vrot.slane %v537_v13, 4  ;;  %v530_v51 = vadd.f32 %v529_v17, %v528_v7  ;;  %v583_v61 = vmul.f32 0.015625, %v491_v30 }
  0x88   :  { %v929_v24 = vpop.eup %928  ;;  %940 = vpow2.f32 %v463_v3  ;;  %v551_v49 = vrot.slane %v550_v59, 4  ;;  %v584_v43 = vmul.f32 0.015625, %v504_v54  ;;  %v585_v2 = vmul.f32 0.015625, %v517_v0 }
  0x89   :  { %v931_v15 = vpop.eup %930  ;;  %942 = vpow2.f32 %v465_v18  ;;  %v539_v5 = vadd.f32 %v538_v56, %v537_v13  ;;  %v557_v34 = vadd.f32 %v929_v24, %v925_v23  ;;  %v586_v62 = vmul.f32 0.015625, %v530_v51 }
  0x8a   :  { %v933_v19 = vpop.eup %932  ;;  %944 = vpow2.f32 %v467_v8  ;;  %v570_v16 = vadd.f32 %v931_v15, %v927_v50  ;;  %v552_v14 = vadd.f32 %v551_v49, %v550_v59  ;;  %v618_v25 = vand.u32 2147483648, %v1871_v10 }
  0x8b   :  { %v935_v40 = vpop.eup %934  ;;  %946 = vpow2.f32 %v469_v63  ;;  %v540_v27 = vrot.slane %v539_v5, 2  ;;  %v558_v37 = vadd.f32 %v933_v19, %v557_v34  ;;  %vm612_vm0 = vweird.f32 %v1871_v10 }
  0x8c   :  { %v937_v48 = vpop.eup %936  ;;  %948 = vpow2.f32 %v471_v22  ;;  %v571_v44 = vadd.f32 %v935_v40, %v570_v16  ;;  %v553_v60 = vrot.slane %v552_v14, 2 }
  0x8d   :  { %v939_v42 = vpop.eup %938  ;;  %950 = vpow2.f32 %v473_v57  ;;  %v541_v39 = vadd.f32 %v540_v27, %v539_v5  ;;  %v559_v45 = vadd.f32 %v937_v48, %v558_v37  ;;  %v619_v27 = vor.u32 1.1754944e-38, %v618_v25 }
  0x8e   :  { %v941_v53 = vpop.eup %940  ;;  %952 = vpow2.f32 %v475_v47  ;;  %v572_v12 = vadd.f32 %v939_v42, %v571_v44  ;;  %v554_v33 = vadd.f32 %v553_v60, %v552_v14 }
  0x8f   :  { %v943_v28 = vpop.eup %942  ;;  %954 = vpow2.f32 %v477_v41  ;;  %v542_v26 = vrot.slane %v541_v39, 1  ;;  %v560_v9 = vadd.f32 %v941_v53, %v559_v45  ;;  %v616_v41 = vand.u32 2147483647, %v1871_v10 }
  0x90   :  { %v945_v29 = vpop.eup %944  ;;  %v573_v36 = vadd.f32 %v943_v28, %v572_v12  ;;  %v555_v3 = vrot.slane %v554_v33, 1  ;;  %956 = vlog2.f32 %v583_v61 }
  0x91   :  { %v947_v55 = vpop.eup %946  ;;  %v543_v11 = vadd.f32 %v542_v26, %v541_v39  ;;  %v561_v38 = vadd.f32 %v945_v29, %v560_v9  ;;  %958 = vrcp.f32 %v1871_v10  ;;  %vm617_vm3 = vcmp.eq.f32.partialorder %v616_v41, 8.507059e+37 }
  0x92   :  { %v949_v32 = vpop.eup %948  ;;  %v574_v18 = vadd.f32 %v947_v55, %v573_v36  ;;  %v556_v31 = vadd.f32 %v555_v3, %v554_v33  ;;  %960 = vlog2.f32 %v584_v43 }
  0x93   :  { %v951_v6 = vpop.eup %950  ;;  %v562_v8 = vadd.f32 %v949_v32, %v561_v38  ;;  %v587_v63 = vmul.f32 0.015625, %v543_v11  ;;  %962 = vlog2.f32 %v585_v2 }
  0x94   :  { %v953_v58 = vpop.eup %952  ;;  %v575_v1 = vadd.f32 %v951_v6, %v574_v18  ;;  %v588_v22 = vmul.f32 0.015625, %v556_v31  ;;  %964 = vlog2.f32 %v586_v62 }
  0x95   :  { %v955_v4 = vpop.eup %954  ;;  %v563_v52 = vadd.f32 %v953_v58, %v562_v8  ;;  %966 = vlog2.f32 %v587_v63 }
  0x96   :  { %v576_v13 = vadd.f32 %v955_v4, %v575_v1  ;;  %v957_v57 = vpop.eup %956  ;;  %968 = vlog2.f32 %v588_v22 }
  0x97   :  { %v564_v35 = vrot.slane %v563_v52, 4  ;;  %v959_v7 = vpop.eup %958  ;;  %v592_v40 = vmul.f32 0.6931472, %v957_v57 }
  0x98   :  { %v577_v23 = vrot.slane %v576_v13, 4  ;;  %v961_v46 = vpop.eup %960  ;;  %v608_v56 = vmul.f32 %v959_v7, %v1871_v10  ;;  %vm613_vm1 = vweird.f32 %v959_v7 }
  0x99   :  { %v565_v21 = vadd.f32 %v564_v35, %v563_v52  ;;  %v963_v59 = vpop.eup %962  ;;  %vm614_vm2 = vmor %vm612_vm0, %vm613_vm1  ;;  %v594_v37 = vmul.f32 0.6931472, %v961_v46 }
  0x9a   :  { %v578_v50 = vadd.f32 %v577_v23, %v576_v13  ;;  %v965_v20 = vpop.eup %964  ;;  %v609_v5 = vsub.f32 1.0, %v608_v56  ;;  %v596_v48 = vmul.f32 0.6931472, %v963_v59 }
  0x9b   :  { %v566_v47 = vrot.slane %v565_v21, 2  ;;  %v967_v49 = vpop.eup %966  ;;  %v598_v44 = vmul.f32 0.6931472, %v965_v20 }
  0x9c   :  { %v579_v24 = vrot.slane %v578_v50, 2  ;;  %v969_v19 = vpop.eup %968  ;;  %v610_v17 = vmul.f32 %v959_v7, %v609_v5  ;;  %v600_v42 = vmul.f32 0.6931472, %v967_v49 }
  0x9d   :  { %v567_v15 = vadd.f32 %v566_v47, %v565_v21  ;;  %v602_v39 = vmul.f32 0.6931472, %v969_v19 }
  0x9e   :  { %v580_v34 = vadd.f32 %v579_v24, %v578_v50  ;;  %v611_v54 = vadd.f32 %v959_v7, %v610_v17 }
  0x9f   :  { %v568_v30 = vrot.slane %v567_v15, 1 }
  0xa0   :  { %v581_v16 = vrot.slane %v580_v34, 1  ;;  %v615_v45 = vsel %vm614_vm2, %v959_v7, %v611_v54 }
  0xa1   :  { %v569_v14 = vadd.f32 %v568_v30, %v567_v15  ;;  %v620_v51 = vsel %vm617_vm3, %v619_v27, %v615_v45 }
  0xa2   :  { %v582_v0 = vadd.f32 %v581_v16, %v580_v34  ;;  %v621_v12 = vmul.f32 %v620_v51, %v592_v40  ;;  %v622_v61 = vmul.f32 %v620_v51, %v594_v37  ;;  %v623_v28 = vmul.f32 %v620_v51, %v596_v48 }
  0xa3   :  { %v589_v60 = vmul.f32 0.015625, %v569_v14  ;;  %v624_v26 = vmul.f32 %v620_v51, %v598_v44  ;;  %v625_v33 = vmul.f32 %v620_v51, %v600_v42  ;;  %v626_v9 = vmul.f32 %v620_v51, %v602_v39 }
  0xa4   :  { %v590_v53 = vmul.f32 0.015625, %v582_v0  ;;  %v629_v29 = vmul.f32 1.442695, %v621_v12  ;;  %v631_v36 = vmul.f32 1.442695, %v622_v61 }
  0xa5   :  { %970 = vlog2.f32 %v589_v60  ;;  %v633_v55 = vmul.f32 1.442695, %v623_v28  ;;  %v635_v11 = vmul.f32 1.442695, %v624_v26  ;;  %v637_v3 = vmul.f32 1.442695, %v625_v33 }
  0xa6   :  { %972 = vlog2.f32 %v590_v53  ;;  %v639_v38 = vmul.f32 1.442695, %v626_v9 }
  0xa7   :  { %974 = vpow2.f32 %v629_v29 }
  0xa8   :  { %976 = vpow2.f32 %v631_v36 }
  0xa9   :  { %978 = vpow2.f32 %v633_v55 }
  0xaa   :  { %980 = vpow2.f32 %v635_v11 }
  0xab   :  { %v971_v43 = vpop.eup %970  ;;  %982 = vpow2.f32 %v637_v3 }
  0xac   :  { %v973_v32 = vpop.eup %972  ;;  %v604_v18 = vmul.f32 0.6931472, %v971_v43  ;;  %984 = vpow2.f32 %v639_v38 }
  0xad   :  { %v606_v2 = vmul.f32 0.6931472, %v973_v32  ;;  %v975_v31 = vpop.eup %974 }
  0xae   :  { %v627_v6 = vmul.f32 %v620_v51, %v604_v18  ;;  %v977_v62 = vpop.eup %976 }
  0xaf   :  { %v628_v8 = vmul.f32 %v620_v51, %v606_v2  ;;  %v979_v1 = vpop.eup %978  ;;  %v653_v10 = vrot.slane %v977_v62, 4 }
  0xb0   :  { %v641_v58 = vmul.f32 1.442695, %v627_v6  ;;  %v981_v4 = vpop.eup %980 }
  0xb1   :  { %v643_v63 = vmul.f32 1.442695, %v628_v8  ;;  %v983_v52 = vpop.eup %982  ;;  %v654_v22 = vrot.slane %v981_v4, 4  ;;  %v658_v23 = vsel %vm657_vm4, %v975_v31, %v653_v10 }
  0xb2   :  { %986 = vpow2.f32 %v641_v58  ;;  %v985_v13 = vpop.eup %984 }
  0xb3   :  { %988 = vpow2.f32 %v643_v63  ;;  %v655_v35 = vrot.slane %v985_v13, 4  ;;  %v659_v57 = vsel %vm657_vm4, %v979_v1, %v654_v22 }
  0xb4   :  { %v662_v21 = vrot.slane %v659_v57, 7 }
  0xb5   :  { %v660_v7 = vsel %vm657_vm4, %v983_v52, %v655_v35 }
  0xb6   :  { %v664_v46 = vsel %vm663_vm5, %v662_v21, %v658_v23  ;;  %v667_v47 = vrot.slane %v660_v7, 6 }
  0xb7   :  { %v666_v59 = vsel %vm665_vm6, %v662_v21, %v664_v46 }
  0xb8   :  { %v987_v50 = vpop.eup %986  ;;  %v669_v41 = vsel %vm668_vm7, %v667_v47, %v666_v59 }
  0xb9   :  { %v989_v56 = vpop.eup %988  ;;  %v671_v20 = vsel %vm670_vm8, %v667_v47, %v669_v41 }
  0xba   :  { %v656_v24 = vrot.slane %v989_v56, 4 }
  0xbc   :  { %v661_v25 = vsel %vm657_vm4, %v987_v50, %v656_v24 }
  0xbd   :  { %v672_v15 = vrot.slane %v661_v25, 5 }
  0xbf   :  { %v674_v5 = vsel %vm673_vm9, %v672_v15, %v671_v20 }
  0xc0   :  { %v676_v49 = vsel %vm675_vm10, %v672_v15, %v674_v5 }
  0xc1   :  { %678 = vst [vmem:[#allocation6] sm:$0xff] %v676_v49 }
  0xc2   :  { %689 = dma.vmem_to_hbm [thread:$0]  %s685_s17, 128, %s687_s20, [#allocation5]  }
  0xc3   :  { %1040 = dma.done.wait [#allocation5], 128  }
  0xc4   :  { %1041 = vsyncadd [#allocation5], 4294967168 }
  0xc5   :  { %694 = vsyncpa [#allocation4], 1 }
  0xc6   :  { %695 = vsyncpa [#allocation5], 1 }

</bundles_post_ra>
